<compile_context>
chip_gen: v5e
topology: v5e:2x2
jax: 0.10.0
libtpu: 0.0.40
codegen_flags: <defaults>
</compile_context>

<pallas_src>
import functools

import jax
import jax.numpy as jnp
from jax import lax
from jax.experimental import pallas as pl
from jax.experimental.pallas import tpu as pltpu


def _round_up(x, m):
    return (x + m - 1) // m * m


# ----------------------------- kernels -----------------------------

def _partial_loss_kernel(batch, tb, idx_ref, logits_ref, conf_hbm, contrib_ref,
                         conf_rows, sems):
    """contrib[i] = sum_c(log_softmax(logits[i]) * confidence[index[i]])."""
    base = pl.program_id(0) * tb

    # Gather the TB confidence rows of this block straight from HBM.
    # Start every row DMA first so they are all in flight, then wait on all.
    for r in range(tb):
        pltpu.make_async_copy(
            conf_hbm.at[pl.ds(idx_ref[base + r], 1), :],
            conf_rows.at[pl.ds(r, 1), :],
            sems.at[r]).start()
    for r in range(tb):
        pltpu.make_async_copy(
            conf_hbm.at[pl.ds(0, 1), :],
            conf_rows.at[pl.ds(r, 1), :],
            sems.at[r]).wait()

    logits = logits_ref[...].astype(jnp.float32)                       # (TB, C)
    shifted = logits - jnp.max(logits, axis=1, keepdims=True)
    logsm = shifted - jnp.log(jnp.sum(jnp.exp(shifted), axis=1, keepdims=True))
    conf = conf_rows[...].astype(jnp.float32)
    contrib = jnp.sum(logsm * conf, axis=1, keepdims=True)             # (TB, 1)

    # Zero the rows that are only padding (batch not a multiple of TB).
    row_id = base + lax.broadcasted_iota(jnp.int32, contrib.shape, 0)
    contrib_ref[...] = jnp.where(row_id < batch, contrib, 0.0)


def _confidence_update_kernel(batch, tb, idx_ref, conf_in_hbm, temp_ref, y_ref,
                              ema_ref, conf_out_hbm, rows, gather_sems,
                              scatter_sems):
    """confidence[idx] = m*confidence[idx] + (1-m)*one_hot(argmax(temp*y))."""
    base = pl.program_id(0) * tb

    # ---- gather: confidence[batch_index[base:base+TB]] -> VMEM (all in flight)
    # Padded slots carry index 0 (harmless read; they are never scattered back).
    for r in range(tb):
        pltpu.make_async_copy(
            conf_in_hbm.at[pl.ds(idx_ref[base + r], 1), :],
            rows.at[pl.ds(r, 1), :],
            gather_sems.at[r]).start()
    for r in range(tb):
        pltpu.make_async_copy(
            conf_in_hbm.at[pl.ds(0, 1), :],
            rows.at[pl.ds(r, 1), :],
            gather_sems.at[r]).wait()

    # ---- pseudo-label + EMA, vectorized over the whole (TB, C) tile ----
    scores = temp_ref[...].astype(jnp.float32) * y_ref[...].astype(jnp.float32)
    c = scores.shape[1]
    col = lax.broadcasted_iota(jnp.int32, scores.shape, 1)
    row_max = jnp.max(scores, axis=1, keepdims=True)
    # torch.max(dim=1) tie-break: first maximal index.  (All-NaN rows yield an
    # all-zero pseudo label instead of torch's NaN propagation.)
    pred = jnp.min(jnp.where(scores == row_max, col, c), axis=1, keepdims=True)
    pseudo = (col == pred).astype(jnp.float32)                         # (TB, C)

    m = ema_ref[0]                                                     # SMEM scalar
    updated = m * rows[...].astype(jnp.float32) + (1.0 - m) * pseudo
    rows[...] = updated.astype(rows.dtype)

    # ---- scatter the updated rows back into the aliased HBM table ----
    # Only valid (non-padding) rows are written; starts/waits are matched.
    for r in range(tb):
        @pl.when(base + r < batch)
        def _():
            pltpu.make_async_copy(
                rows.at[pl.ds(r, 1), :],
                conf_out_hbm.at[pl.ds(idx_ref[base + r], 1), :],
                scatter_sems.at[r]).start()
    for r in range(tb):
        @pl.when(base + r < batch)
        def _():
            pltpu.make_async_copy(
                rows.at[pl.ds(r, 1), :],
                conf_out_hbm.at[pl.ds(0, 1), :],
                scatter_sems.at[r]).wait()


# ----------------------------- wrappers -----------------------------

@functools.partial(jax.jit, static_argnames=("block_rows",))
def partial_loss_forward(outputs, confidence, index, block_rows=128):
    """PartialLoss.forward(outputs, index) -> scalar loss."""
    b, c = outputs.shape
    tb = min(_round_up(block_rows, 8), _round_up(b, 8))   # rows per grid step
    nb = (b + tb - 1) // tb
    bp = nb * tb

    idx = index.astype(jnp.int32)
    if bp != b:                                            # pad to full blocks
        outputs = jnp.pad(outputs, ((0, bp - b), (0, 0)))
        idx = jnp.pad(idx, (0, bp - b))

    kernel = functools.partial(_partial_loss_kernel, b, tb)
    contrib = pl.pallas_call(
        kernel,
        grid_spec=pltpu.PrefetchScalarGridSpec(
            num_scalar_prefetch=1,                          # index -> SMEM
            grid=(nb,),
            in_specs=[
                pl.BlockSpec((tb, c), lambda i, idx_sm: (i, 0)),   # logits rows
                pl.BlockSpec(memory_space=pl.ANY),                 # confidence (HBM)
            ],
            out_specs=pl.BlockSpec((tb, 1), lambda i, idx_sm: (i, 0)),
            scratch_shapes=[
                pltpu.VMEM((tb, c), confidence.dtype),             # gathered rows
                pltpu.SemaphoreType.DMA((tb,)),
            ],
        ),
        out_shape=jax.ShapeDtypeStruct((bp, 1), jnp.float32),
        compiler_params=pltpu.CompilerParams(
            dimension_semantics=("parallel",)),             # blocks independent (2 TCs on v7x)
    )(idx, outputs, confidence)
    return -jnp.sum(contrib) / b                            # scale applied once


@functools.partial(jax.jit, donate_argnums=(0,), static_argnames=("block_rows",))
def confidence_update(confidence, temp_un_conf, batch_index, y_batch,
                      conf_ema_m, block_rows=128):
    """PartialLoss.confidence_update -> updated confidence table (in place)."""
    n, c = confidence.shape
    b = y_batch.shape[0]
    tb = min(_round_up(block_rows, 8), _round_up(b, 8))
    nb = (b + tb - 1) // tb
    bp = nb * tb

    idx = batch_index.astype(jnp.int32)
    if bp != b:
        idx = jnp.pad(idx, (0, bp - b))
        temp_un_conf = jnp.pad(temp_un_conf, ((0, bp - b), (0, 0)))
        y_batch = jnp.pad(y_batch, ((0, bp - b), (0, 0)))
    ema = jnp.reshape(jnp.asarray(conf_ema_m, jnp.float32), (1,))

    kernel = functools.partial(_confidence_update_kernel, b, tb)
    return pl.pallas_call(
        kernel,
        grid_spec=pltpu.PrefetchScalarGridSpec(
            num_scalar_prefetch=1,                          # batch_index -> SMEM
            grid=(nb,),
            in_specs=[
                pl.BlockSpec(memory_space=pl.ANY),                 # confidence (HBM, aliased)
                pl.BlockSpec((tb, c), lambda i, idx_sm: (i, 0)),   # temp_un_conf rows
                pl.BlockSpec((tb, c), lambda i, idx_sm: (i, 0)),   # y_batch rows
                pl.BlockSpec(memory_space=pltpu.MemorySpace.SMEM), # conf_ema_m scalar
            ],
            out_specs=pl.BlockSpec(memory_space=pl.ANY),           # aliased table, DMA scatter
            scratch_shapes=[
                pltpu.VMEM((tb, c), confidence.dtype),             # row work buffer
                pltpu.SemaphoreType.DMA((tb,)),                    # gather sems
                pltpu.SemaphoreType.DMA((tb,)),                    # scatter sems
            ],
        ),
        out_shape=jax.ShapeDtypeStruct((n, c), confidence.dtype),
        # Flat input index counts the scalar-prefetch operand: confidence is 1.
        input_output_aliases={1: 0},
        compiler_params=pltpu.CompilerParams(
            dimension_semantics=("arbitrary",)),            # sequential blocks: well-defined
    )(idx, confidence, temp_un_conf, y_batch, ema)


def set_conf_ema_m(epoch, num_epochs, start=0.95, end=0.8):
    """PartialLoss.set_conf_ema_m."""
    return epoch / num_epochs * (end - start) + start


# ----------------------------- demo -----------------------------

if __name__ == "__main__":
    key = jax.random.PRNGKey(0)
    NUM_SAMPLES, NUM_CLASS, BATCH = 64, 10, 10     # small, exercises padding + 2 blocks (TB=8)

    k_cand, k_logits, k_temp, k_perm = jax.random.split(key, 4)

    # Candidate (partial) label matrix, >= 1 candidate per row.
    cand = (jax.random.uniform(k_cand, (NUM_SAMPLES, NUM_CLASS)) < 0.4).astype(jnp.float32)
    cand = jnp.maximum(cand, jax.nn.one_hot(
        jnp.arange(NUM_SAMPLES) % NUM_CLASS, NUM_CLASS, dtype=jnp.float32))

    # PiCO initializes `confidence` as the row-normalized candidate matrix.
    confidence = cand / jnp.sum(cand, axis=1, keepdims=True)           # (N, C) f32

    # Unique dataset rows for this batch (dataloader-style, no duplicates).
    index = jax.random.permutation(k_perm, NUM_SAMPLES)[:BATCH].astype(jnp.int32)
    outputs = jax.random.normal(k_logits, (BATCH, NUM_CLASS), jnp.float32)
    temp_un_conf = jax.nn.softmax(
        jax.random.normal(k_temp, (BATCH, NUM_CLASS), jnp.float32), axis=1)
    y_batch = cand[index]
    conf_ema_m = set_conf_ema_m(epoch=3, num_epochs=10)                # 0.905

    # ---- forward (loss) + pure-JAX reference ----
    loss = partial_loss_forward(outputs, confidence, index, block_rows=8)
    loss_ref = -jnp.mean(jnp.sum(
        jax.nn.log_softmax(outputs, axis=1) * confidence[index, :], axis=1))

    # ---- confidence_update reference (computed BEFORE the donating call) ----
    pred_ref = jnp.argmax(temp_un_conf * y_batch, axis=1)
    pseudo_ref = jax.nn.one_hot(pred_ref, NUM_CLASS, dtype=jnp.float32)
    conf_expected = confidence.at[index].set(
        conf_ema_m * confidence[index] + (1.0 - conf_ema_m) * pseudo_ref)

    # ---- confidence_update kernel (donates + aliases the table in place) ----
    new_confidence = confidence_update(confidence, temp_un_conf, index,
                                       y_batch, conf_ema_m, block_rows=8)

    jax.block_until_ready((loss, new_confidence))

    assert loss.shape == ()
    assert new_confidence.shape == (NUM_SAMPLES, NUM_CLASS)
    assert jnp.allclose(loss, loss_ref, rtol=1e-4, atol=1e-4)
    # Checks both the B updated rows and that untouched rows were not corrupted
    # (would catch a mis-aimed alias / scatter).
    assert jnp.allclose(new_confidence, conf_expected, rtol=1e-5, atol=1e-5)

    print("KERNEL_OK")
</pallas_src>

<mosaic_0001>
module attributes {stable_mosaic.version = 11 : i64} {
  func.func @_partial_loss_kernel(%arg0: i32, %arg1: memref<16xi32, #tpu.memory_space<smem>>, %arg2: memref<8x10xf32, #tpu.memory_space<vmem>>, %arg3: memref<64x10xf32, #tpu.memory_space<any>>, %arg4: memref<8x1xf32, #tpu.memory_space<vmem>>, %arg5: memref<8x10xf32, #tpu.memory_space<vmem>>, %arg6: memref<8x!tpu.dma_semaphore, #tpu.memory_space<semaphore_mem>>) attributes {dimension_semantics = [#tpu.dimension_semantics<parallel>], iteration_bounds = array<i64: 2>, scalar_prefetch = 1 : i64, scratch_operands = 2 : i64, tpu.core_type = #tpu.core_type<tc>, window_params = [{transform_indices = @transform_0, window_bounds = array<i64: 8, 10>}, {}, {transform_indices = @transform_2, window_bounds = array<i64: 8, 1>}]} {
    %c8_i32 = arith.constant 8 : i32
    %0 = arith.muli %arg0, %c8_i32 : i32
    %c0_i32 = arith.constant 0 : i32
    %1 = arith.addi %0, %c0_i32 : i32
    %2 = arith.index_cast %1 : i32 to index
    %3 = memref.load %arg1[%2] : memref<16xi32, #tpu.memory_space<smem>>
    %c0_i32_0 = arith.constant 0 : i32
    %c0_i32_1 = arith.constant 0 : i32
    %4 = tpu.memref_slice %arg3[%3, %c0_i32_1] : memref<64x10xf32, #tpu.memory_space<any>> -> memref<1x10xf32, #tpu.memory_space<any>>
    %c0_i32_2 = arith.constant 0 : i32
    %c0_i32_3 = arith.constant 0 : i32
    %5 = tpu.memref_slice %arg5[%c0_i32_2, %c0_i32_3] : memref<8x10xf32, #tpu.memory_space<vmem>> -> memref<1x10xf32, #tpu.memory_space<vmem>>
    %6 = tpu.memref_slice %arg6[%c0_i32_0] : memref<8x!tpu.dma_semaphore, #tpu.memory_space<semaphore_mem>> -> memref<1x!tpu.dma_semaphore, #tpu.memory_space<semaphore_mem>>
    %7 = tpu.memref_squeeze %6 : memref<1x!tpu.dma_semaphore, #tpu.memory_space<semaphore_mem>> -> memref<!tpu.dma_semaphore, #tpu.memory_space<semaphore_mem>>
    tpu.enqueue_dma source(%4 : memref<1x10xf32, #tpu.memory_space<any>>) target(%5 : memref<1x10xf32, #tpu.memory_space<vmem>>) target_semaphore(%7 : memref<!tpu.dma_semaphore, #tpu.memory_space<semaphore_mem>>)
    %c1_i32 = arith.constant 1 : i32
    %8 = arith.addi %0, %c1_i32 : i32
    %9 = arith.index_cast %8 : i32 to index
    %10 = memref.load %arg1[%9] : memref<16xi32, #tpu.memory_space<smem>>
    %c1_i32_4 = arith.constant 1 : i32
    %c0_i32_5 = arith.constant 0 : i32
    %11 = tpu.memref_slice %arg3[%10, %c0_i32_5] : memref<64x10xf32, #tpu.memory_space<any>> -> memref<1x10xf32, #tpu.memory_space<any>>
    %c1_i32_6 = arith.constant 1 : i32
    %c0_i32_7 = arith.constant 0 : i32
    %12 = tpu.memref_slice %arg5[%c1_i32_6, %c0_i32_7] : memref<8x10xf32, #tpu.memory_space<vmem>> -> memref<1x10xf32, #tpu.memory_space<vmem>>
    %13 = tpu.memref_slice %arg6[%c1_i32_4] : memref<8x!tpu.dma_semaphore, #tpu.memory_space<semaphore_mem>> -> memref<1x!tpu.dma_semaphore, #tpu.memory_space<semaphore_mem>>
    %14 = tpu.memref_squeeze %13 : memref<1x!tpu.dma_semaphore, #tpu.memory_space<semaphore_mem>> -> memref<!tpu.dma_semaphore, #tpu.memory_space<semaphore_mem>>
    tpu.enqueue_dma source(%11 : memref<1x10xf32, #tpu.memory_space<any>>) target(%12 : memref<1x10xf32, #tpu.memory_space<vmem>>) target_semaphore(%14 : memref<!tpu.dma_semaphore, #tpu.memory_space<semaphore_mem>>)
    %c2_i32 = arith.constant 2 : i32
    %15 = arith.addi %0, %c2_i32 : i32
    %16 = arith.index_cast %15 : i32 to index
    %17 = memref.load %arg1[%16] : memref<16xi32, #tpu.memory_space<smem>>
    %c2_i32_8 = arith.constant 2 : i32
    %c0_i32_9 = arith.constant 0 : i32
    %18 = tpu.memref_slice %arg3[%17, %c0_i32_9] : memref<64x10xf32, #tpu.memory_space<any>> -> memref<1x10xf32, #tpu.memory_space<any>>
    %c2_i32_10 = arith.constant 2 : i32
    %c0_i32_11 = arith.constant 0 : i32
    %19 = tpu.memref_slice %arg5[%c2_i32_10, %c0_i32_11] : memref<8x10xf32, #tpu.memory_space<vmem>> -> memref<1x10xf32, #tpu.memory_space<vmem>>
    %20 = tpu.memref_slice %arg6[%c2_i32_8] : memref<8x!tpu.dma_semaphore, #tpu.memory_space<semaphore_mem>> -> memref<1x!tpu.dma_semaphore, #tpu.memory_space<semaphore_mem>>
    %21 = tpu.memref_squeeze %20 : memref<1x!tpu.dma_semaphore, #tpu.memory_space<semaphore_mem>> -> memref<!tpu.dma_semaphore, #tpu.memory_space<semaphore_mem>>
    tpu.enqueue_dma source(%18 : memref<1x10xf32, #tpu.memory_space<any>>) target(%19 : memref<1x10xf32, #tpu.memory_space<vmem>>) target_semaphore(%21 : memref<!tpu.dma_semaphore, #tpu.memory_space<semaphore_mem>>)
    %c3_i32 = arith.constant 3 : i32
    %22 = arith.addi %0, %c3_i32 : i32
    %23 = arith.index_cast %22 : i32 to index
    %24 = memref.load %arg1[%23] : memref<16xi32, #tpu.memory_space<smem>>
    %c3_i32_12 = arith.constant 3 : i32
    %c0_i32_13 = arith.constant 0 : i32
    %25 = tpu.memref_slice %arg3[%24, %c0_i32_13] : memref<64x10xf32, #tpu.memory_space<any>> -> memref<1x10xf32, #tpu.memory_space<any>>
    %c3_i32_14 = arith.constant 3 : i32
    %c0_i32_15 = arith.constant 0 : i32
    %26 = tpu.memref_slice %arg5[%c3_i32_14, %c0_i32_15] : memref<8x10xf32, #tpu.memory_space<vmem>> -> memref<1x10xf32, #tpu.memory_space<vmem>>
    %27 = tpu.memref_slice %arg6[%c3_i32_12] : memref<8x!tpu.dma_semaphore, #tpu.memory_space<semaphore_mem>> -> memref<1x!tpu.dma_semaphore, #tpu.memory_space<semaphore_mem>>
    %28 = tpu.memref_squeeze %27 : memref<1x!tpu.dma_semaphore, #tpu.memory_space<semaphore_mem>> -> memref<!tpu.dma_semaphore, #tpu.memory_space<semaphore_mem>>
    tpu.enqueue_dma source(%25 : memref<1x10xf32, #tpu.memory_space<any>>) target(%26 : memref<1x10xf32, #tpu.memory_space<vmem>>) target_semaphore(%28 : memref<!tpu.dma_semaphore, #tpu.memory_space<semaphore_mem>>)
    %c4_i32 = arith.constant 4 : i32
    %29 = arith.addi %0, %c4_i32 : i32
    %30 = arith.index_cast %29 : i32 to index
    %31 = memref.load %arg1[%30] : memref<16xi32, #tpu.memory_space<smem>>
    %c4_i32_16 = arith.constant 4 : i32
    %c0_i32_17 = arith.constant 0 : i32
    %32 = tpu.memref_slice %arg3[%31, %c0_i32_17] : memref<64x10xf32, #tpu.memory_space<any>> -> memref<1x10xf32, #tpu.memory_space<any>>
    %c4_i32_18 = arith.constant 4 : i32
    %c0_i32_19 = arith.constant 0 : i32
    %33 = tpu.memref_slice %arg5[%c4_i32_18, %c0_i32_19] : memref<8x10xf32, #tpu.memory_space<vmem>> -> memref<1x10xf32, #tpu.memory_space<vmem>>
    %34 = tpu.memref_slice %arg6[%c4_i32_16] : memref<8x!tpu.dma_semaphore, #tpu.memory_space<semaphore_mem>> -> memref<1x!tpu.dma_semaphore, #tpu.memory_space<semaphore_mem>>
    %35 = tpu.memref_squeeze %34 : memref<1x!tpu.dma_semaphore, #tpu.memory_space<semaphore_mem>> -> memref<!tpu.dma_semaphore, #tpu.memory_space<semaphore_mem>>
    tpu.enqueue_dma source(%32 : memref<1x10xf32, #tpu.memory_space<any>>) target(%33 : memref<1x10xf32, #tpu.memory_space<vmem>>) target_semaphore(%35 : memref<!tpu.dma_semaphore, #tpu.memory_space<semaphore_mem>>)
    %c5_i32 = arith.constant 5 : i32
    %36 = arith.addi %0, %c5_i32 : i32
    %37 = arith.index_cast %36 : i32 to index
    %38 = memref.load %arg1[%37] : memref<16xi32, #tpu.memory_space<smem>>
    %c5_i32_20 = arith.constant 5 : i32
    %c0_i32_21 = arith.constant 0 : i32
    %39 = tpu.memref_slice %arg3[%38, %c0_i32_21] : memref<64x10xf32, #tpu.memory_space<any>> -> memref<1x10xf32, #tpu.memory_space<any>>
    %c5_i32_22 = arith.constant 5 : i32
    %c0_i32_23 = arith.constant 0 : i32
    %40 = tpu.memref_slice %arg5[%c5_i32_22, %c0_i32_23] : memref<8x10xf32, #tpu.memory_space<vmem>> -> memref<1x10xf32, #tpu.memory_space<vmem>>
    %41 = tpu.memref_slice %arg6[%c5_i32_20] : memref<8x!tpu.dma_semaphore, #tpu.memory_space<semaphore_mem>> -> memref<1x!tpu.dma_semaphore, #tpu.memory_space<semaphore_mem>>
    %42 = tpu.memref_squeeze %41 : memref<1x!tpu.dma_semaphore, #tpu.memory_space<semaphore_mem>> -> memref<!tpu.dma_semaphore, #tpu.memory_space<semaphore_mem>>
    tpu.enqueue_dma source(%39 : memref<1x10xf32, #tpu.memory_space<any>>) target(%40 : memref<1x10xf32, #tpu.memory_space<vmem>>) target_semaphore(%42 : memref<!tpu.dma_semaphore, #tpu.memory_space<semaphore_mem>>)
    %c6_i32 = arith.constant 6 : i32
    %43 = arith.addi %0, %c6_i32 : i32
    %44 = arith.index_cast %43 : i32 to index
    %45 = memref.load %arg1[%44] : memref<16xi32, #tpu.memory_space<smem>>
    %c6_i32_24 = arith.constant 6 : i32
    %c0_i32_25 = arith.constant 0 : i32
    %46 = tpu.memref_slice %arg3[%45, %c0_i32_25] : memref<64x10xf32, #tpu.memory_space<any>> -> memref<1x10xf32, #tpu.memory_space<any>>
    %c6_i32_26 = arith.constant 6 : i32
    %c0_i32_27 = arith.constant 0 : i32
    %47 = tpu.memref_slice %arg5[%c6_i32_26, %c0_i32_27] : memref<8x10xf32, #tpu.memory_space<vmem>> -> memref<1x10xf32, #tpu.memory_space<vmem>>
    %48 = tpu.memref_slice %arg6[%c6_i32_24] : memref<8x!tpu.dma_semaphore, #tpu.memory_space<semaphore_mem>> -> memref<1x!tpu.dma_semaphore, #tpu.memory_space<semaphore_mem>>
    %49 = tpu.memref_squeeze %48 : memref<1x!tpu.dma_semaphore, #tpu.memory_space<semaphore_mem>> -> memref<!tpu.dma_semaphore, #tpu.memory_space<semaphore_mem>>
    tpu.enqueue_dma source(%46 : memref<1x10xf32, #tpu.memory_space<any>>) target(%47 : memref<1x10xf32, #tpu.memory_space<vmem>>) target_semaphore(%49 : memref<!tpu.dma_semaphore, #tpu.memory_space<semaphore_mem>>)
    %c7_i32 = arith.constant 7 : i32
    %50 = arith.addi %0, %c7_i32 : i32
    %51 = arith.index_cast %50 : i32 to index
    %52 = memref.load %arg1[%51] : memref<16xi32, #tpu.memory_space<smem>>
    %c7_i32_28 = arith.constant 7 : i32
    %c0_i32_29 = arith.constant 0 : i32
    %53 = tpu.memref_slice %arg3[%52, %c0_i32_29] : memref<64x10xf32, #tpu.memory_space<any>> -> memref<1x10xf32, #tpu.memory_space<any>>
    %c7_i32_30 = arith.constant 7 : i32
    %c0_i32_31 = arith.constant 0 : i32
    %54 = tpu.memref_slice %arg5[%c7_i32_30, %c0_i32_31] : memref<8x10xf32, #tpu.memory_space<vmem>> -> memref<1x10xf32, #tpu.memory_space<vmem>>
    %55 = tpu.memref_slice %arg6[%c7_i32_28] : memref<8x!tpu.dma_semaphore, #tpu.memory_space<semaphore_mem>> -> memref<1x!tpu.dma_semaphore, #tpu.memory_space<semaphore_mem>>
    %56 = tpu.memref_squeeze %55 : memref<1x!tpu.dma_semaphore, #tpu.memory_space<semaphore_mem>> -> memref<!tpu.dma_semaphore, #tpu.memory_space<semaphore_mem>>
    tpu.enqueue_dma source(%53 : memref<1x10xf32, #tpu.memory_space<any>>) target(%54 : memref<1x10xf32, #tpu.memory_space<vmem>>) target_semaphore(%56 : memref<!tpu.dma_semaphore, #tpu.memory_space<semaphore_mem>>)
    %c0_i32_32 = arith.constant 0 : i32
    %c0_i32_33 = arith.constant 0 : i32
    %c0_i32_34 = arith.constant 0 : i32
    %57 = tpu.memref_slice %arg3[%c0_i32_33, %c0_i32_34] : memref<64x10xf32, #tpu.memory_space<any>> -> memref<1x10xf32, #tpu.memory_space<any>>
    %c0_i32_35 = arith.constant 0 : i32
    %c0_i32_36 = arith.constant 0 : i32
    %58 = tpu.memref_slice %arg5[%c0_i32_35, %c0_i32_36] : memref<8x10xf32, #tpu.memory_space<vmem>> -> memref<1x10xf32, #tpu.memory_space<vmem>>
    %59 = tpu.memref_slice %arg6[%c0_i32_32] : memref<8x!tpu.dma_semaphore, #tpu.memory_space<semaphore_mem>> -> memref<1x!tpu.dma_semaphore, #tpu.memory_space<semaphore_mem>>
    %60 = tpu.memref_squeeze %59 : memref<1x!tpu.dma_semaphore, #tpu.memory_space<semaphore_mem>> -> memref<!tpu.dma_semaphore, #tpu.memory_space<semaphore_mem>>
    tpu.wait_dma2 semaphore(%60 : memref<!tpu.dma_semaphore, #tpu.memory_space<semaphore_mem>>) src(%57 : memref<1x10xf32, #tpu.memory_space<any>>) dst(%58 : memref<1x10xf32, #tpu.memory_space<vmem>>)
    %c1_i32_37 = arith.constant 1 : i32
    %c0_i32_38 = arith.constant 0 : i32
    %c0_i32_39 = arith.constant 0 : i32
    %61 = tpu.memref_slice %arg3[%c0_i32_38, %c0_i32_39] : memref<64x10xf32, #tpu.memory_space<any>> -> memref<1x10xf32, #tpu.memory_space<any>>
    %c1_i32_40 = arith.constant 1 : i32
    %c0_i32_41 = arith.constant 0 : i32
    %62 = tpu.memref_slice %arg5[%c1_i32_40, %c0_i32_41] : memref<8x10xf32, #tpu.memory_space<vmem>> -> memref<1x10xf32, #tpu.memory_space<vmem>>
    %63 = tpu.memref_slice %arg6[%c1_i32_37] : memref<8x!tpu.dma_semaphore, #tpu.memory_space<semaphore_mem>> -> memref<1x!tpu.dma_semaphore, #tpu.memory_space<semaphore_mem>>
    %64 = tpu.memref_squeeze %63 : memref<1x!tpu.dma_semaphore, #tpu.memory_space<semaphore_mem>> -> memref<!tpu.dma_semaphore, #tpu.memory_space<semaphore_mem>>
    tpu.wait_dma2 semaphore(%64 : memref<!tpu.dma_semaphore, #tpu.memory_space<semaphore_mem>>) src(%61 : memref<1x10xf32, #tpu.memory_space<any>>) dst(%62 : memref<1x10xf32, #tpu.memory_space<vmem>>)
    %c2_i32_42 = arith.constant 2 : i32
    %c0_i32_43 = arith.constant 0 : i32
    %c0_i32_44 = arith.constant 0 : i32
    %65 = tpu.memref_slice %arg3[%c0_i32_43, %c0_i32_44] : memref<64x10xf32, #tpu.memory_space<any>> -> memref<1x10xf32, #tpu.memory_space<any>>
    %c2_i32_45 = arith.constant 2 : i32
    %c0_i32_46 = arith.constant 0 : i32
    %66 = tpu.memref_slice %arg5[%c2_i32_45, %c0_i32_46] : memref<8x10xf32, #tpu.memory_space<vmem>> -> memref<1x10xf32, #tpu.memory_space<vmem>>
    %67 = tpu.memref_slice %arg6[%c2_i32_42] : memref<8x!tpu.dma_semaphore, #tpu.memory_space<semaphore_mem>> -> memref<1x!tpu.dma_semaphore, #tpu.memory_space<semaphore_mem>>
    %68 = tpu.memref_squeeze %67 : memref<1x!tpu.dma_semaphore, #tpu.memory_space<semaphore_mem>> -> memref<!tpu.dma_semaphore, #tpu.memory_space<semaphore_mem>>
    tpu.wait_dma2 semaphore(%68 : memref<!tpu.dma_semaphore, #tpu.memory_space<semaphore_mem>>) src(%65 : memref<1x10xf32, #tpu.memory_space<any>>) dst(%66 : memref<1x10xf32, #tpu.memory_space<vmem>>)
    %c3_i32_47 = arith.constant 3 : i32
    %c0_i32_48 = arith.constant 0 : i32
    %c0_i32_49 = arith.constant 0 : i32
    %69 = tpu.memref_slice %arg3[%c0_i32_48, %c0_i32_49] : memref<64x10xf32, #tpu.memory_space<any>> -> memref<1x10xf32, #tpu.memory_space<any>>
    %c3_i32_50 = arith.constant 3 : i32
    %c0_i32_51 = arith.constant 0 : i32
    %70 = tpu.memref_slice %arg5[%c3_i32_50, %c0_i32_51] : memref<8x10xf32, #tpu.memory_space<vmem>> -> memref<1x10xf32, #tpu.memory_space<vmem>>
    %71 = tpu.memref_slice %arg6[%c3_i32_47] : memref<8x!tpu.dma_semaphore, #tpu.memory_space<semaphore_mem>> -> memref<1x!tpu.dma_semaphore, #tpu.memory_space<semaphore_mem>>
    %72 = tpu.memref_squeeze %71 : memref<1x!tpu.dma_semaphore, #tpu.memory_space<semaphore_mem>> -> memref<!tpu.dma_semaphore, #tpu.memory_space<semaphore_mem>>
    tpu.wait_dma2 semaphore(%72 : memref<!tpu.dma_semaphore, #tpu.memory_space<semaphore_mem>>) src(%69 : memref<1x10xf32, #tpu.memory_space<any>>) dst(%70 : memref<1x10xf32, #tpu.memory_space<vmem>>)
    %c4_i32_52 = arith.constant 4 : i32
    %c0_i32_53 = arith.constant 0 : i32
    %c0_i32_54 = arith.constant 0 : i32
    %73 = tpu.memref_slice %arg3[%c0_i32_53, %c0_i32_54] : memref<64x10xf32, #tpu.memory_space<any>> -> memref<1x10xf32, #tpu.memory_space<any>>
    %c4_i32_55 = arith.constant 4 : i32
    %c0_i32_56 = arith.constant 0 : i32
    %74 = tpu.memref_slice %arg5[%c4_i32_55, %c0_i32_56] : memref<8x10xf32, #tpu.memory_space<vmem>> -> memref<1x10xf32, #tpu.memory_space<vmem>>
    %75 = tpu.memref_slice %arg6[%c4_i32_52] : memref<8x!tpu.dma_semaphore, #tpu.memory_space<semaphore_mem>> -> memref<1x!tpu.dma_semaphore, #tpu.memory_space<semaphore_mem>>
    %76 = tpu.memref_squeeze %75 : memref<1x!tpu.dma_semaphore, #tpu.memory_space<semaphore_mem>> -> memref<!tpu.dma_semaphore, #tpu.memory_space<semaphore_mem>>
    tpu.wait_dma2 semaphore(%76 : memref<!tpu.dma_semaphore, #tpu.memory_space<semaphore_mem>>) src(%73 : memref<1x10xf32, #tpu.memory_space<any>>) dst(%74 : memref<1x10xf32, #tpu.memory_space<vmem>>)
    %c5_i32_57 = arith.constant 5 : i32
    %c0_i32_58 = arith.constant 0 : i32
    %c0_i32_59 = arith.constant 0 : i32
    %77 = tpu.memref_slice %arg3[%c0_i32_58, %c0_i32_59] : memref<64x10xf32, #tpu.memory_space<any>> -> memref<1x10xf32, #tpu.memory_space<any>>
    %c5_i32_60 = arith.constant 5 : i32
    %c0_i32_61 = arith.constant 0 : i32
    %78 = tpu.memref_slice %arg5[%c5_i32_60, %c0_i32_61] : memref<8x10xf32, #tpu.memory_space<vmem>> -> memref<1x10xf32, #tpu.memory_space<vmem>>
    %79 = tpu.memref_slice %arg6[%c5_i32_57] : memref<8x!tpu.dma_semaphore, #tpu.memory_space<semaphore_mem>> -> memref<1x!tpu.dma_semaphore, #tpu.memory_space<semaphore_mem>>
    %80 = tpu.memref_squeeze %79 : memref<1x!tpu.dma_semaphore, #tpu.memory_space<semaphore_mem>> -> memref<!tpu.dma_semaphore, #tpu.memory_space<semaphore_mem>>
    tpu.wait_dma2 semaphore(%80 : memref<!tpu.dma_semaphore, #tpu.memory_space<semaphore_mem>>) src(%77 : memref<1x10xf32, #tpu.memory_space<any>>) dst(%78 : memref<1x10xf32, #tpu.memory_space<vmem>>)
    %c6_i32_62 = arith.constant 6 : i32
    %c0_i32_63 = arith.constant 0 : i32
    %c0_i32_64 = arith.constant 0 : i32
    %81 = tpu.memref_slice %arg3[%c0_i32_63, %c0_i32_64] : memref<64x10xf32, #tpu.memory_space<any>> -> memref<1x10xf32, #tpu.memory_space<any>>
    %c6_i32_65 = arith.constant 6 : i32
    %c0_i32_66 = arith.constant 0 : i32
    %82 = tpu.memref_slice %arg5[%c6_i32_65, %c0_i32_66] : memref<8x10xf32, #tpu.memory_space<vmem>> -> memref<1x10xf32, #tpu.memory_space<vmem>>
    %83 = tpu.memref_slice %arg6[%c6_i32_62] : memref<8x!tpu.dma_semaphore, #tpu.memory_space<semaphore_mem>> -> memref<1x!tpu.dma_semaphore, #tpu.memory_space<semaphore_mem>>
    %84 = tpu.memref_squeeze %83 : memref<1x!tpu.dma_semaphore, #tpu.memory_space<semaphore_mem>> -> memref<!tpu.dma_semaphore, #tpu.memory_space<semaphore_mem>>
    tpu.wait_dma2 semaphore(%84 : memref<!tpu.dma_semaphore, #tpu.memory_space<semaphore_mem>>) src(%81 : memref<1x10xf32, #tpu.memory_space<any>>) dst(%82 : memref<1x10xf32, #tpu.memory_space<vmem>>)
    %c7_i32_67 = arith.constant 7 : i32
    %c0_i32_68 = arith.constant 0 : i32
    %c0_i32_69 = arith.constant 0 : i32
    %85 = tpu.memref_slice %arg3[%c0_i32_68, %c0_i32_69] : memref<64x10xf32, #tpu.memory_space<any>> -> memref<1x10xf32, #tpu.memory_space<any>>
    %c7_i32_70 = arith.constant 7 : i32
    %c0_i32_71 = arith.constant 0 : i32
    %86 = tpu.memref_slice %arg5[%c7_i32_70, %c0_i32_71] : memref<8x10xf32, #tpu.memory_space<vmem>> -> memref<1x10xf32, #tpu.memory_space<vmem>>
    %87 = tpu.memref_slice %arg6[%c7_i32_67] : memref<8x!tpu.dma_semaphore, #tpu.memory_space<semaphore_mem>> -> memref<1x!tpu.dma_semaphore, #tpu.memory_space<semaphore_mem>>
    %88 = tpu.memref_squeeze %87 : memref<1x!tpu.dma_semaphore, #tpu.memory_space<semaphore_mem>> -> memref<!tpu.dma_semaphore, #tpu.memory_space<semaphore_mem>>
    tpu.wait_dma2 semaphore(%88 : memref<!tpu.dma_semaphore, #tpu.memory_space<semaphore_mem>>) src(%85 : memref<1x10xf32, #tpu.memory_space<any>>) dst(%86 : memref<1x10xf32, #tpu.memory_space<vmem>>)
    %c0 = arith.constant 0 : index
    %c0_72 = arith.constant 0 : index
    %89 = vector.load %arg2[%c0, %c0_72] : memref<8x10xf32, #tpu.memory_space<vmem>>, vector<8x10xf32>
    %cst = arith.constant dense<0xFF800000> : vector<8xf32>
    %90 = vector.multi_reduction <maximumf>, %89, %cst [1] : vector<8x10xf32> to vector<8xf32>
    %91 = vector.shape_cast %90 : vector<8xf32> to vector<8x1xf32>
    %92 = vector.broadcast %91 : vector<8x1xf32> to vector<8x10xf32>
    %93 = arith.subf %89, %92 : vector<8x10xf32>
    %94 = math.exp %93 : vector<8x10xf32>
    %cst_73 = arith.constant dense<0.000000e+00> : vector<8xf32>
    %95 = vector.multi_reduction <add>, %94, %cst_73 [1] : vector<8x10xf32> to vector<8xf32>
    %96 = vector.shape_cast %95 : vector<8xf32> to vector<8x1xf32>
    %97 = math.log %96 : vector<8x1xf32>
    %98 = vector.broadcast %97 : vector<8x1xf32> to vector<8x10xf32>
    %99 = arith.subf %93, %98 : vector<8x10xf32>
    %c0_74 = arith.constant 0 : index
    %c0_75 = arith.constant 0 : index
    %100 = vector.load %arg5[%c0_74, %c0_75] : memref<8x10xf32, #tpu.memory_space<vmem>>, vector<8x10xf32>
    %101 = arith.mulf %99, %100 : vector<8x10xf32>
    %cst_76 = arith.constant dense<0.000000e+00> : vector<8xf32>
    %102 = vector.multi_reduction <add>, %101, %cst_76 [1] : vector<8x10xf32> to vector<8xf32>
    %103 = vector.shape_cast %102 : vector<8xf32> to vector<8x1xf32>
    %104 = tpu.iota {dimensions = array<i32: 0>} : vector<8x1xi32>
    %105 = vector.broadcast %0 : i32 to vector<8x1xi32>
    %106 = arith.addi %105, %104 : vector<8x1xi32>
    %c10_i32 = arith.constant 10 : i32
    %107 = vector.broadcast %c10_i32 : i32 to vector<8x1xi32>
    %108 = arith.cmpi slt, %106, %107 : vector<8x1xi32>
    %cst_77 = arith.constant 0.000000e+00 : f32
    %109 = vector.broadcast %cst_77 : f32 to vector<8x1xf32>
    %110 = arith.select %108, %103, %109 : vector<8x1xi1>, vector<8x1xf32>
    %c0_78 = arith.constant 0 : index
    %c0_79 = arith.constant 0 : index
    %111 = vector.load %arg4[%c0_78, %c0_79] : memref<8x1xf32, #tpu.memory_space<vmem>>, vector<8x1xf32>
    tpu.vector_store %arg4[%c0_78, %c0_79], %110 {strides = array<i32>} : memref<8x1xf32, #tpu.memory_space<vmem>>, vector<8x1xf32>,
    return
  }
  func.func @transform_0(%arg0: i32, %arg1: memref<16xi32, #tpu.memory_space<smem>>) -> (i32, i32) {
    %c0_i32 = arith.constant 0 : i32
    %c0_i32_0 = arith.constant 0 : i32
    return %arg0, %c0_i32 : i32, i32
  }
  func.func @transform_2(%arg0: i32, %arg1: memref<16xi32, #tpu.memory_space<smem>>) -> (i32, i32) {
    %c0_i32 = arith.constant 0 : i32
    %c0_i32_0 = arith.constant 0 : i32
    return %arg0, %c0_i32 : i32, i32
  }
}

</mosaic_0001>

<bundles_post_ra>
// kernel: partial_loss_forward.1
= control target key start
LH: loop header
LB: loop body
LE: loop exit
PB: predicated region body
PF: predicated region fallthrough
CT: control target
= control target key end

     0   :  { %s693_s15 = smov [#allocation5]   ;;  %s778_s0 = inlined_call_operand.vmem [shape: s32[16], index: 0, kind: input, shape index: {}]   ;;  %s779_s1 = inlined_call_operand.vmem [shape: f32[16,10], index: 1, kind: input, shape index: {}]   ;;  %s780_s2 = inlined_call_operand.vmem [shape: f32[64,10], index: 2, kind: input, shape index: {}]   ;;  %s781_s3 = inlined_call_operand.vmem [shape: f32[16,1], index: 3, kind: output, shape index: {}]  }
   0x1   :  { %s9_s14 = sshll.u32 %s778_s0, 4  ;;  %s10_s14 = int_to_ptr.vmem [resolvable:$true] %s9_s14 }
   0x2   :  { %12 = dma.vmem_to_smem %s10_s14, 16, %s693_s15, [#allocation4] }
   0x3   :  { %671 = dma.done.wait [#allocation4], 16 }
   0x4   :  { %672 = vsyncadd [#allocation4], 4294967280 }
   0x5   :  { %15 = sfence }
   0x6   :  { %s717_s16 = smov 0  }
   0x7 LB: > { %s624_s17 = sadd.s32 4294967295, %s691_s16   ;;  %p628_p0 = scmp.ge.s32.totalorder %s691_s16, 1  ;;  %s691_s16 = sphi %s717_s16, %s21_s16  }
   0x8   : > { %p96_p1 = scmp.lt.s32.totalorder %s691_s16, 3 }
   0xa   : > { %p97_p2 = pnand %p628_p0, %p96_p1 }
   0xb   : > { %p114_p3 = scmp.lt.s32.totalorder (!%p97_p2), %s624_s17, 1  ;;  %s725_s0 = sshll.u32 (!%p97_p2), %s624_s17, 3 }
   0xc   : > { %100 = sbr.rel (%p97_p2) target bundleno = 485 (0x1e5), region = 24  ;;  %s123_s18 = sld [smem:[#allocation5 + %s725_s0]] (!%p97_p2) }
  0x11   : > { %s783_s17 = smov (!%p114_p3, %s624_s17), 1 }
  0x12   : > { %s629_s19 = sshll.u32 %s783_s17, 3  ;;  %s124_s28 = scalar_lea.vmem %s780_s2, %s123_s18 }
  0x13   : > { %s731_s22 = scalar_lea.vmem %s779_s1, %s629_s19  ;;  %s736_s25 = scalar_lea.vmem %s781_s3, %s629_s19  ;;  %v139_v0 = vld [vmem:[%s124_s28] sm:$0x1] }
  0x14   : > { %140 = vst [vmem:[#allocation2] sm:$0x1] %v139_v0 }
  0x15   : > { %158 = vsyncadd [#allocation3], 16  ;;  %s159_s29 = sadd.s32 1, %s725_s0 }
  0x16   : > { %s160_s30 = sld [smem:[#allocation5 + %s159_s29]] }
  0x1c   : > { %s161_s6 = scalar_lea.vmem %s780_s2, %s160_s30 }
  0x1d   : > { %v178_v1 = vld [vmem:[%s161_s6] sm:$0x1] }
  0x1e   : > { %179 = vst [vmem:[#allocation2 + $0x1] sm:$0x1] %v178_v1 }
  0x1f   : > { %197 = vsyncadd [#allocation3 + $0x1], 16  ;;  %s198_s7 = sadd.s32 2, %s725_s0 }
  0x20   : > { %s199_s8 = sld [smem:[#allocation5 + %s198_s7]] }
  0x26   : > { %s200_s11 = scalar_lea.vmem %s780_s2, %s199_s8 }
  0x27   : > { %v217_v2 = vld [vmem:[%s200_s11] sm:$0x1] }
  0x28   : > { %218 = vst [vmem:[#allocation2 + $0x2] sm:$0x1] %v217_v2 }
  0x29   : > { %236 = vsyncadd [#allocation3 + $0x2], 16  ;;  %s237_s12 = sadd.s32 3, %s725_s0 }
  0x2a   : > { %s238_s13 = sld [smem:[#allocation5 + %s237_s12]] }
  0x30   : > { %s239_s17 = scalar_lea.vmem %s780_s2, %s238_s13 }
  0x31   : > { %v256_v3 = vld [vmem:[%s239_s17] sm:$0x1] }
  0x32   : > { %257 = vst [vmem:[#allocation2 + $0x3] sm:$0x1] %v256_v3 }
  0x33   : > { %275 = vsyncadd [#allocation3 + $0x3], 16  ;;  %s276_s18 = sadd.s32 4, %s725_s0 }
  0x34   : > { %s277_s19 = sld [smem:[#allocation5 + %s276_s18]] }
  0x3a   : > { %s278_s23 = scalar_lea.vmem %s780_s2, %s277_s19 }
  0x3b   : > { %v295_v4 = vld [vmem:[%s278_s23] sm:$0x1] }
  0x3c   : > { %296 = vst [vmem:[#allocation2 + $0x4] sm:$0x1] %v295_v4 }
  0x3d   : > { %314 = vsyncadd [#allocation3 + $0x4], 16  ;;  %s315_s24 = sadd.s32 5, %s725_s0 }
  0x3e   : > { %s316_s26 = sld [smem:[#allocation5 + %s315_s24]] }
  0x44   : > { %s317_s29 = scalar_lea.vmem %s780_s2, %s316_s26 }
  0x45   : > { %v334_v5 = vld [vmem:[%s317_s29] sm:$0x1] }
  0x46   : > { %335 = vst [vmem:[#allocation2 + $0x5] sm:$0x1] %v334_v5 }
  0x47   : > { %353 = vsyncadd [#allocation3 + $0x5], 16  ;;  %s354_s30 = sadd.s32 6, %s725_s0 }
  0x48   : > { %s355_s4 = sld [smem:[#allocation5 + %s354_s30]] }
  0x4e   : > { %s356_s7 = scalar_lea.vmem %s780_s2, %s355_s4 }
  0x4f   : > { %v373_v6 = vld [vmem:[%s356_s7] sm:$0x1] }
  0x50   : > { %374 = vst [vmem:[#allocation2 + $0x6] sm:$0x1] %v373_v6 }
  0x51   : > { %392 = vsyncadd [#allocation3 + $0x6], 16  ;;  %s393_s8 = sadd.s32 7, %s725_s0 }
  0x52   : > { %s394_s9 = sld [smem:[#allocation5 + %s393_s8]] }
  0x58   : > { %s395_s12 = scalar_lea.vmem %s780_s2, %s394_s9 }
  0x59   : > { %v412_v7 = vld [vmem:[%s395_s12] sm:$0x1] }
  0x5a   : > { %413 = vst [vmem:[#allocation2 + $0x7] sm:$0x1] %v412_v7 }
  0x5b   : > { %431 = vsyncadd [#allocation3 + $0x7], 16 }
  0x5c   : > { %673 = dma.done.wait [#allocation3], 16 }
  0x5d   : > { %674 = vsyncadd [#allocation3], 4294967280 }
  0x5e   : > { %675 = dma.done.wait [#allocation3 + $0x1], 16 }
  0x5f   : > { %676 = vsyncadd [#allocation3 + $0x1], 4294967280 }
  0x60   : > { %677 = dma.done.wait [#allocation3 + $0x2], 16 }
  0x61   : > { %678 = vsyncadd [#allocation3 + $0x2], 4294967280 }
  0x62   : > { %679 = dma.done.wait [#allocation3 + $0x3], 16 }
  0x63   : > { %680 = vsyncadd [#allocation3 + $0x3], 4294967280 }
  0x64   : > { %681 = dma.done.wait [#allocation3 + $0x4], 16 }
  0x65   : > { %682 = vsyncadd [#allocation3 + $0x4], 4294967280 }
  0x66   : > { %683 = dma.done.wait [#allocation3 + $0x5], 16 }
  0x67   : > { %684 = vsyncadd [#allocation3 + $0x5], 4294967280 }
  0x68   : > { %685 = dma.done.wait [#allocation3 + $0x6], 16 }
  0x69   : > { %686 = vsyncadd [#allocation3 + $0x6], 4294967280 }
  0x6a   : > { %687 = dma.done.wait [#allocation3 + $0x7], 16 }
  0x6b   : > { %688 = vsyncadd [#allocation3 + $0x7], 4294967280  ;;  %vm450_vm0 = vcmask 80896   ;;  %v449_v8 = vld [vmem:[%s731_s22] sm:$0xff]  ;;  %v468_v22 = vlaneseq  ;;  %v470_v24 = vstv %s725_s0  ;;  %vm474_vm2 = vcmask 7168  }
  0x6c   : > { %v451_v9 = vsel %vm450_vm0, %v449_v8, -inf  ;;  %v463_v18 = vld [vmem:[#allocation2] sm:$0xff] }
  0x6d   : > { %452 = vmax.xlane.f32.xlu0 %v451_v9  ;;  %v469_v23 = vshrl.u32 %v468_v22, 7 }
  0x6f   : > { %v471_v25 = vadd.s32 %v470_v24, %v469_v23 }
  0x71   : > { %vm472_vm1 = vcmp.lt.s32.totalorder %v471_v25, 10 }
  0xe0   : > { %v453_v10 = vpop.xlane.xlu0 %452 }
  0xe1   : > { %v454_v11 = vsub.f32 %v449_v8, %v453_v10 }
  0xe3   : > { %v455_v12 = vmul.f32 1.442695, %v454_v11 }
  0xe5   : > { %651 = vpow2.f32 %v455_v12 }
  0xeb   : > { %v652_v13 = vpop.eup %651 }
  0xec   : > { %v457_v14 = vsel %vm450_vm0, %v652_v13, 0.0 }
  0xed   : > { %458 = vadd.xlane.f32.xlu0 %v457_v14 }
 0x160   : > { %v459_v15 = vpop.xlane.xlu0 %458 }
 0x161   : > { %653 = vlog2.f32 %v459_v15 }
 0x167   : > { %v654_v16 = vpop.eup %653 }
 0x168   : > { %v461_v17 = vmul.f32 0.6931472, %v654_v16 }
 0x16a   : > { %v462_v19 = vsub.f32 %v454_v11, %v461_v17 }
 0x16c   : > { %v464_v20 = vmul.f32 %v463_v18, %v462_v19 }
 0x16e   : > { %v465_v21 = vsel %vm450_vm0, %v464_v20, 0.0 }
 0x16f   : > { %466 = vadd.xlane.f32.xlu1 %v465_v21 }
 0x1e2   : > { %v467_v26 = vpop.xlane.xlu1 %466 }
 0x1e3   : > { %v473_v27 = vsel %vm472_vm1, %v467_v26, 0.0 }
 0x1e4   : > { %475 = vst.msk [vmem:[%s736_s25] sm:$0xff] %vm474_vm2, %v473_v27 }
 0x1e5 PF: > { %s21_s16 = sadd.s32 1, %s691_s16  }
 0x1e6   : > { %p18_p4 = scmp.ge.s32.totalorder %s21_s16, 4  }
 0x1e8   :  { %20 = sbr.rel (!%p18_p4) target bundleno = 7 (0x7), region = 355 }
 0x1ed   :  { %495 = vsyncmov [#allocation3] }
 0x1f0   :  { %s496_s22 = vpop.sfrf %495 }
 0x1f1   :  { %p634_p5 = scmp.ne.s32.totalorder %s496_s22, 0 }
 0x1f3   :  { %500 = shalt.err (%p634_p5)  }
 0x1f4   :  { %502 = vsyncmov [#allocation3 + $0x1] }
 0x1f7   :  { %s503_s13 = vpop.sfrf %502 }
 0x1f8   :  { %p635_p6 = scmp.ne.s32.totalorder %s503_s13, 0 }
 0x1fa   :  { %507 = shalt.err (%p635_p6)  }
 0x1fb   :  { %509 = vsyncmov [#allocation3 + $0x2] }
 0x1fe   :  { %s510_s0 = vpop.sfrf %509 }
 0x1ff   :  { %p636_p7 = scmp.ne.s32.totalorder %s510_s0, 0 }
 0x201   :  { %514 = shalt.err (%p636_p7)  }
 0x202   :  { %516 = vsyncmov [#allocation3 + $0x3] }
 0x205   :  { %s517_s25 = vpop.sfrf %516 }
 0x206   :  { %p637_p8 = scmp.ne.s32.totalorder %s517_s25, 0 }
 0x208   :  { %521 = shalt.err (%p637_p8)  }
 0x209   :  { %523 = vsyncmov [#allocation3 + $0x4] }
 0x20c   :  { %s524_s14 = vpop.sfrf %523 }
 0x20d   :  { %p638_p9 = scmp.ne.s32.totalorder %s524_s14, 0 }
 0x20f   :  { %528 = shalt.err (%p638_p9)  }
 0x210   :  { %530 = vsyncmov [#allocation3 + $0x5] }
 0x213   :  { %s531_s1 = vpop.sfrf %530 }
 0x214   :  { %p639_p10 = scmp.ne.s32.totalorder %s531_s1, 0 }
 0x216   :  { %535 = shalt.err (%p639_p10)  }
 0x217   :  { %537 = vsyncmov [#allocation3 + $0x6] }
 0x21a   :  { %s538_s2 = vpop.sfrf %537 }
 0x21b   :  { %p640_p11 = scmp.ne.s32.totalorder %s538_s2, 0 }
 0x21d   :  { %542 = shalt.err (%p640_p11)  }
 0x21e   :  { %544 = vsyncmov [#allocation3 + $0x7] }
 0x221   :  { %s545_s3 = vpop.sfrf %544 }
 0x222   :  { %p641_p12 = scmp.ne.s32.totalorder %s545_s3, 0 }
 0x224   :  { %549 = shalt.err (%p641_p12)  }

</bundles_post_ra>
